<compile_context>
chip_gen: v7x
topology: tpu7x:2x2x1
jax: 0.10.0
libtpu: 0.0.40
codegen_flags: <defaults>
</compile_context>

<pallas_src>
import math

import jax
import jax.numpy as jnp
from jax.experimental import pallas as pl
from jax.experimental.pallas import tpu as pltpu

EPS = 1e-5  # torch.nn.LayerNorm default


def _ln_add_kernel(x_ref, c_ref, g_ref, b2_ref, o_ref):
    """o = LayerNorm(x) + LayerNorm(c) for one (tm, H) row tile.

    g_ref: (1, H) gamma.  b2_ref: (1, H) holding 2*beta (beta appears once per
    LayerNorm, so the two bias adds are folded into one).  Both use a constant
    index_map and stay VMEM-resident across grid steps.
    """
    x = x_ref[...].astype(jnp.float32)
    c = c_ref[...].astype(jnp.float32)

    def _norm(v):
        mu = jnp.mean(v, axis=-1, keepdims=True)
        ctr = v - mu
        var = jnp.mean(ctr * ctr, axis=-1, keepdims=True)
        return ctr * jax.lax.rsqrt(var + EPS)

    y = (_norm(x) + _norm(c)) * g_ref[...] + b2_ref[...]
    o_ref[...] = y.astype(o_ref.dtype)


def _layernorm_jnp(v, gamma, beta, eps=EPS):
    """Plain-JAX LayerNorm over the last axis (f32 math) — reference."""
    v32 = v.astype(jnp.float32)
    mu = jnp.mean(v32, axis=-1, keepdims=True)
    var = jnp.mean((v32 - mu) ** 2, axis=-1, keepdims=True)
    return (v32 - mu) * jax.lax.rsqrt(var + eps) * gamma + beta


def _vmem_capacity_bytes():
    """Per-core VMEM capacity; conservative (v7x) fallback if query fails."""
    try:
        cap = getattr(pltpu.get_tpu_info(), "vmem_capacity_bytes", None)
        if cap:
            return int(cap)
    except Exception:
        pass
    return 64 * 1024 * 1024


def _choose_tm(rows, max_tm):
    """Row-tile size.

    Prefers the largest multiple-of-8 exact divisor of `rows` that fits the
    VMEM budget and leaves >= 2 grid steps (so both v7x TensorCores get work).
    Small non-8-divisible row counts use a single full-array block (always a
    legal block shape).  Otherwise falls back to a ragged grid whose partial
    last block is masked on store by Pallas.
    """
    max_tm = max(8, max_tm - max_tm % 8)
    d = min(max_tm, rows // 2)
    d -= d % 8
    while d >= 8:
        if rows % d == 0:
            return d
        d -= 8
    if rows <= min(max_tm, 128):
        return rows  # single full-array block (block_shape == array shape)
    # Ragged grid: aim for ~2+ steps; Pallas masks the partial last block.
    half = (((rows + 1) // 2) + 7) // 8 * 8
    return min(max_tm, half)


def layernorm_const_eval_pass(x, const, gamma, beta):
    """Pallas equivalent of: LayerNorm(const) + LayerNorm(x) over the last axis."""
    assert x.shape == const.shape
    *lead, H = x.shape
    rows = math.prod(lead) if lead else 1

    x2 = x.reshape(rows, H)
    c2 = const.reshape(rows, H)
    g2 = gamma.reshape(1, H).astype(jnp.float32)
    b2 = (2.0 * beta.astype(jnp.float32)).reshape(1, H)  # folded bias

    dtype_bytes = jnp.dtype(x.dtype).itemsize
    vmem_cap = _vmem_capacity_bytes()

    # Per-step VMEM cost: double-buffered streamed x / const / out tiles plus
    # ~5 f32 in-kernel temporaries (upcasts, centered, y) of shape (tm, H).
    per_row = (3 * 2 * dtype_bytes + 5 * 4) * H
    budget = max(8 * 1024 * 1024,
                 min(vmem_cap - 24 * 1024 * 1024, 56 * 1024 * 1024))
    max_tm = min(max(budget // per_row, 8), 8192)

    tm = _choose_tm(rows, max_tm)
    grid = pl.cdiv(rows, tm)

    working = per_row * tm + 2 * 2 * H * 4  # + resident gamma / 2*beta
    vmem_limit = int(min(max(working + 4 * 1024 * 1024, 16 * 1024 * 1024),
                         max(vmem_cap - 16 * 1024 * 1024, 32 * 1024 * 1024)))

    # Note: for best HBM efficiency H should be a multiple of 128 (lane-dense
    # stores); the toy H=32 simply falls back to masked partial stores.
    out = pl.pallas_call(
        _ln_add_kernel,
        out_shape=jax.ShapeDtypeStruct((rows, H), x.dtype),
        grid=(grid,),
        in_specs=[
            pl.BlockSpec((tm, H), lambda i: (i, 0)),  # x rows     (streamed)
            pl.BlockSpec((tm, H), lambda i: (i, 0)),  # const rows (streamed)
            pl.BlockSpec((1, H), lambda i: (0, 0)),   # gamma      (resident)
            pl.BlockSpec((1, H), lambda i: (0, 0)),   # 2*beta     (resident)
        ],
        out_specs=pl.BlockSpec((tm, H), lambda i: (i, 0)),
        compiler_params=pltpu.CompilerParams(
            dimension_semantics=("parallel",),  # rows shard across v7x TCs
            vmem_limit_bytes=vmem_limit,
        ),
    )(x2, c2, g2, b2)

    return out.reshape(*lead, H)


if __name__ == "__main__":
    # Small shapes consistent with the module: x of shape (B, S, H),
    # LayerNorm(normalized_shape=H).
    B, S, H = 2, 8, 32
    key = jax.random.PRNGKey(0)
    kx, kc = jax.random.split(key)

    x = jax.random.uniform(kx, (B, S, H), jnp.float32, minval=-1.0, maxval=1.0)
    # Deterministic stand-in for TensorUtils.create_torch_constant (~[-1, 1]).
    const = jax.random.uniform(kc, (B, S, H), jnp.float32, minval=-1.0, maxval=1.0)

    # torch.nn.LayerNorm default affine init: weight = 1, bias = 0.
    gamma = jnp.ones((H,), jnp.float32)
    beta = jnp.zeros((H,), jnp.float32)

    out = layernorm_const_eval_pass(x, const, gamma, beta)
    out = jax.block_until_ready(out)

    ref = (_layernorm_jnp(x, gamma, beta) +
           _layernorm_jnp(const, gamma, beta)).astype(x.dtype)
    assert out.shape == (B, S, H)
    assert jnp.allclose(out, ref, atol=1e-5, rtol=1e-5), "mismatch vs reference"
    print("KERNEL_OK")
</pallas_src>

<mosaic_0001>
module attributes {stable_mosaic.version = 11 : i64} {
  func.func @_ln_add_kernel(%arg0: i32, %arg1: memref<8x32xf32, #tpu.memory_space<vmem>>, %arg2: memref<8x32xf32, #tpu.memory_space<vmem>>, %arg3: memref<1x32xf32, #tpu.memory_space<vmem>>, %arg4: memref<1x32xf32, #tpu.memory_space<vmem>>, %arg5: memref<8x32xf32, #tpu.memory_space<vmem>>) attributes {dimension_semantics = [#tpu.dimension_semantics<parallel>], iteration_bounds = array<i64: 2>, scalar_prefetch = 0 : i64, scratch_operands = 0 : i64, tpu.core_type = #tpu.core_type<tc>, window_params = [{transform_indices = @transform_0, window_bounds = array<i64: 8, 32>}, {transform_indices = @transform_1, window_bounds = array<i64: 8, 32>}, {pipeline_mode = #tpu.pipeline_mode<synchronous>, transform_indices = @transform_2, window_bounds = array<i64: 1, 32>}, {pipeline_mode = #tpu.pipeline_mode<synchronous>, transform_indices = @transform_3, window_bounds = array<i64: 1, 32>}, {transform_indices = @transform_4, window_bounds = array<i64: 8, 32>}]} {
    %c0 = arith.constant 0 : index
    %c0_0 = arith.constant 0 : index
    %0 = vector.load %arg1[%c0, %c0_0] : memref<8x32xf32, #tpu.memory_space<vmem>>, vector<8x32xf32>
    %c0_1 = arith.constant 0 : index
    %c0_2 = arith.constant 0 : index
    %1 = vector.load %arg2[%c0_1, %c0_2] : memref<8x32xf32, #tpu.memory_space<vmem>>, vector<8x32xf32>
    %cst = arith.constant dense<0.000000e+00> : vector<8xf32>
    %2 = vector.multi_reduction <add>, %0, %cst [1] : vector<8x32xf32> to vector<8xf32>
    %3 = vector.shape_cast %2 : vector<8xf32> to vector<8x1xf32>
    %cst_3 = arith.constant 3.200000e+01 : f32
    %4 = vector.broadcast %cst_3 : f32 to vector<8x1xf32>
    %5 = arith.divf %3, %4 : vector<8x1xf32>
    %6 = vector.broadcast %5 : vector<8x1xf32> to vector<8x32xf32>
    %7 = arith.subf %0, %6 : vector<8x32xf32>
    %8 = arith.mulf %7, %7 : vector<8x32xf32>
    %cst_4 = arith.constant dense<0.000000e+00> : vector<8xf32>
    %9 = vector.multi_reduction <add>, %8, %cst_4 [1] : vector<8x32xf32> to vector<8xf32>
    %10 = vector.shape_cast %9 : vector<8xf32> to vector<8x1xf32>
    %cst_5 = arith.constant 3.200000e+01 : f32
    %11 = vector.broadcast %cst_5 : f32 to vector<8x1xf32>
    %12 = arith.divf %10, %11 : vector<8x1xf32>
    %cst_6 = arith.constant 9.99999974E-6 : f32
    %13 = vector.broadcast %cst_6 : f32 to vector<8x1xf32>
    %14 = arith.addf %12, %13 : vector<8x1xf32>
    %15 = math.rsqrt %14 : vector<8x1xf32>
    %16 = vector.broadcast %15 : vector<8x1xf32> to vector<8x32xf32>
    %17 = arith.mulf %7, %16 : vector<8x32xf32>
    %cst_7 = arith.constant dense<0.000000e+00> : vector<8xf32>
    %18 = vector.multi_reduction <add>, %1, %cst_7 [1] : vector<8x32xf32> to vector<8xf32>
    %19 = vector.shape_cast %18 : vector<8xf32> to vector<8x1xf32>
    %cst_8 = arith.constant 3.200000e+01 : f32
    %20 = vector.broadcast %cst_8 : f32 to vector<8x1xf32>
    %21 = arith.divf %19, %20 : vector<8x1xf32>
    %22 = vector.broadcast %21 : vector<8x1xf32> to vector<8x32xf32>
    %23 = arith.subf %1, %22 : vector<8x32xf32>
    %24 = arith.mulf %23, %23 : vector<8x32xf32>
    %cst_9 = arith.constant dense<0.000000e+00> : vector<8xf32>
    %25 = vector.multi_reduction <add>, %24, %cst_9 [1] : vector<8x32xf32> to vector<8xf32>
    %26 = vector.shape_cast %25 : vector<8xf32> to vector<8x1xf32>
    %cst_10 = arith.constant 3.200000e+01 : f32
    %27 = vector.broadcast %cst_10 : f32 to vector<8x1xf32>
    %28 = arith.divf %26, %27 : vector<8x1xf32>
    %cst_11 = arith.constant 9.99999974E-6 : f32
    %29 = vector.broadcast %cst_11 : f32 to vector<8x1xf32>
    %30 = arith.addf %28, %29 : vector<8x1xf32>
    %31 = math.rsqrt %30 : vector<8x1xf32>
    %32 = vector.broadcast %31 : vector<8x1xf32> to vector<8x32xf32>
    %33 = arith.mulf %23, %32 : vector<8x32xf32>
    %34 = arith.addf %17, %33 : vector<8x32xf32>
    %c0_12 = arith.constant 0 : index
    %c0_13 = arith.constant 0 : index
    %35 = vector.load %arg3[%c0_12, %c0_13] : memref<1x32xf32, #tpu.memory_space<vmem>>, vector<1x32xf32>
    %36 = vector.broadcast %35 : vector<1x32xf32> to vector<8x32xf32>
    %37 = arith.mulf %34, %36 : vector<8x32xf32>
    %c0_14 = arith.constant 0 : index
    %c0_15 = arith.constant 0 : index
    %38 = vector.load %arg4[%c0_14, %c0_15] : memref<1x32xf32, #tpu.memory_space<vmem>>, vector<1x32xf32>
    %39 = vector.broadcast %38 : vector<1x32xf32> to vector<8x32xf32>
    %40 = arith.addf %37, %39 : vector<8x32xf32>
    %c0_16 = arith.constant 0 : index
    %c0_17 = arith.constant 0 : index
    %41 = vector.load %arg5[%c0_16, %c0_17] : memref<8x32xf32, #tpu.memory_space<vmem>>, vector<8x32xf32>
    tpu.vector_store %arg5[%c0_16, %c0_17], %40 {strides = array<i32>} : memref<8x32xf32, #tpu.memory_space<vmem>>, vector<8x32xf32>,
    return
  }
  func.func @transform_0(%arg0: i32) -> (i32, i32) {
    %c0_i32 = arith.constant 0 : i32
    %c0_i32_0 = arith.constant 0 : i32
    return %arg0, %c0_i32 : i32, i32
  }
  func.func @transform_1(%arg0: i32) -> (i32, i32) {
    %c0_i32 = arith.constant 0 : i32
    %c0_i32_0 = arith.constant 0 : i32
    return %arg0, %c0_i32 : i32, i32
  }
  func.func @transform_2(%arg0: i32) -> (i32, i32) {
    %c0_i32 = arith.constant 0 : i32
    %c0_i32_0 = arith.constant 0 : i32
    %c0_i32_1 = arith.constant 0 : i32
    return %c0_i32, %c0_i32_0 : i32, i32
  }
  func.func @transform_3(%arg0: i32) -> (i32, i32) {
    %c0_i32 = arith.constant 0 : i32
    %c0_i32_0 = arith.constant 0 : i32
    %c0_i32_1 = arith.constant 0 : i32
    return %c0_i32, %c0_i32_0 : i32, i32
  }
  func.func @transform_4(%arg0: i32) -> (i32, i32) {
    %c0_i32 = arith.constant 0 : i32
    %c0_i32_0 = arith.constant 0 : i32
    return %arg0, %c0_i32 : i32, i32
  }
}

</mosaic_0001>

<bundles_post_ra>
// kernel: tpu_custom_call.1
= control target key start
LH: loop header
LB: loop body
LE: loop exit
PB: predicated region body
PF: predicated region fallthrough
CT: control target
= control target key end

     0   :  { %9 = vsyncpa [#allocation3], 0  ;;  %s862_s0 = inlined_call_operand.hbm [shape: f32[16,32], index: 0, kind: input, shape index: {}]   ;;  %s863_s1 = inlined_call_operand.hbm [shape: f32[16,32], index: 1, kind: input, shape index: {}]   ;;  %s864_s2 = inlined_call_operand.vmem [shape: f32[1,32], index: 2, kind: input, shape index: {}]   ;;  %s865_s3 = inlined_call_operand.vmem [shape: f32[1,32], index: 3, kind: input, shape index: {}]   ;;  %s866_s4 = inlined_call_operand.hbm [shape: f32[16,32], index: 4, kind: output, shape index: {}]  }
   0x1   :  { %11 = vsyncpa [#allocation3 + $0x1], 0 }
   0x2   :  { %12 = vsyncpa [#allocation6], 0 }
   0x3   :  { %14 = vsyncpa [#allocation6 + $0x1], 0 }
   0x4   :  { %15 = vsyncpa [#allocation4], 0 }
   0x5   :  { %17 = vsyncpa [#allocation4 + $0x1], 0  ;;  %s637_s15 = smov 0   ;;  %s639_s16 = smov 0  }
   0x6   :  { %s641_s17 = smov 0   ;;  %s643_s18 = smov 0  }
   0x7 LB: > { %s658_s19 = sadd.s32 4294967295, %s607_s18   ;;  %s405_s20 = sadd.s32 4294967294, %s607_s18   ;;  %s607_s18 = sphi %s643_s18, %s885_s18   ;;  %s603_s17 = sphi %s641_s17, %s884_s17   ;;  %s599_s16 = sphi %s639_s16, %s883_s16   ;;  %s595_s15 = sphi %s637_s15, %s882_s15  }
   0x8   : > { %s662_s21 = sadd.s32 1, %s607_s18   ;;  %s30_s22 = sadd.s32 1, %s603_s17 }
   0x9   : > { %s27_s23 = ssub.s32 %s607_s18, %s662_s21  ;;  %p37_p0 = scmp.ne.s32.totalorder %s603_s17, %s599_s16 }
   0xa   : > { %p28_p1 = scmp.eq.s32.totalorder %s27_s23, 0  ;;  %p38_p2 = scmp.eq.s32.totalorder %s607_s18, 0 }
   0xb   : > { %p43_p3 = scmp.ne.s32.totalorder %s599_s16, %s595_s15  ;;  %p44_p4 = scmp.eq.s32.totalorder %s658_s19, 0 }
   0xc   : > { %s674_s24 = scalar_select %p28_p1, %s603_s17, %s30_s22  }
   0xd   : > { %p676_p5 = por %p38_p2, %p37_p0  ;;  %p680_p6 = por %p44_p4, %p43_p3 }
   0xe   : > { %p135_p7 = scmp.eq.s32.totalorder %s658_s19, 1  ;;  %p141_p8 = scmp.eq.s32.totalorder %s405_s20, 1 }
   0xf   : > { %s870_s26 = scalar_select %p680_p6, 1, 0 }
  0x10   : > { %p439_p10 = scmp.lt.s32.totalorder %s607_s18, 2  ;;  %p687_p11 = por %p135_p7, %p37_p0 }
  0x11   : > { %p691_p12 = por %p141_p8, %p43_p3  ;;  %s696_s29 = sand.u32 1, %s603_s17  }
  0x12   : > { %s871_s27 = scalar_select %p687_p11, 1, 0 }
  0x13   : > { %s872_s28 = scalar_select %p691_p12, 1, 0 }
  0x14   : > { %s409_s30 = sshll.u32 %s607_s18, 7  ;;  %s408_s5 = sshll.u32 %s696_s29, 3 }
  0x15   : > { %s705_s8 = scalar_lea.hbm %s862_s0, %s409_s30  ;;  %s171_s9 = scalar_lea.vmem [#allocation2], %s408_s5 }
  0x16   : > { %s178_s10 = sshll.u32 %s171_s9, 4  ;;  %p711_p13 = pnand %p439_p10, %p676_p5  ;;  %s715_s10 = int_to_ptr.vmem [resolvable:$true] %s178_s10 }
  0x17   : > { %s168_s12 = scalar_lea.sflag [#allocation3], %s696_s29  ;;  %s477_s13 = scalar_lea.hbm %s705_s8, 128 }
  0x18   : > { %p478_p2 = scmp.ne.s32.totalorder %s705_s8, %s477_s13  ;;  %p479_p3 = pneg %p711_p13 }
  0x19   : > { %s482_s22 = scalar_lea.hbm %s862_s0, 256  ;;  %p483_p5 = scmp.lt.u32.totalorder %s705_s8, %s862_s0 }
  0x1a   : > { %p480_p4 = pnand %p479_p3, %p478_p2  ;;  %p484_p8 = scmp.lt.u32.totalorder %s482_s22, %s477_s13 }
  0x1b   : > { %p486_p9 = scmp.lt.u32.totalorder %s477_s13, %s705_s8 }
  0x1c   : > { %p481_p7 = pneg %p480_p4  ;;  %p485_p10 = por %p484_p8, %p483_p5 }
  0x1e   : > { %p487_p0 = por %p486_p9, %p485_p10 }
  0x20   : > { %p488_p1 = pnand %p487_p0, %p481_p7 }
  0x22   : > { %491 = shalt.err (!%p488_p1)
}
  0x23   : > { %s492_s6 = scalar_lea.vmem %s715_s10, 128  ;;  %s609_s7 = smov [#allocation2]  }
  0x24   : > { %p493_p2 = scmp.ne.s32.totalorder %s715_s10, %s492_s6  ;;  %s497_s9 = sshll.u32 %s609_s7, 4  ;;  %s498_s9 = int_to_ptr.vmem [resolvable:$false] %s497_s9 }
  0x25   : > { %s499_s14 = scalar_lea.vmem %s498_s9, 256  ;;  %p500_p11 = scmp.lt.s32.totalorder %s715_s10, %s498_s9 }
  0x26   : > { %p495_p4 = pnand %p493_p2, %p479_p3  ;;  %p501_p5 = scmp.lt.s32.totalorder %s499_s14, %s492_s6 }
  0x28   : > { %p496_p12 = pneg %p495_p4  ;;  %p502_p8 = por %p501_p5, %p500_p11 }
  0x2a   : > { %p503_p9 = pnand %p502_p8, %p496_p12 }
  0x2c   : > { %506 = shalt.err (!%p503_p9)
}
  0x2d   : > { %431 = dma.hbm_to_vmem [thread:$0]  (!%p711_p13), %s705_s8, 128, %s715_s10, %s168_s12  }
  0x2e   : > { %p874_p0 = scmp.lt.s32.totalorder %s607_s18, 3  ;;  %p875_p1 = scmp.ge.s32.totalorder %s607_s18, 1 }
  0x2f   : > { %s758_s23 = scalar_lea.hbm %s863_s1, %s409_s30  ;;  %s189_s25 = scalar_lea.vmem [#allocation5], %s408_s5 }
  0x30   : > { %p749_p7 = pnand %p875_p1, %p874_p0  ;;  %s196_s6 = sshll.u32 %s189_s25, 4  ;;  %s197_s6 = int_to_ptr.vmem [resolvable:$true] %s196_s6 }
  0x31   : > { %s186_s8 = scalar_lea.sflag [#allocation6], %s696_s29  ;;  %s507_s10 = scalar_lea.hbm %s758_s23, 128 }
  0x32   : > { %s876_s13 = scalar_select %p749_p7, 1, 0 }
  0x33   : > { %p508_p11 = scmp.ne.s32.totalorder %s758_s23, %s507_s10  ;;  %s512_s30 = scalar_lea.hbm %s863_s1, 256 }
  0x34   : > { %p513_p2 = scmp.lt.u32.totalorder %s758_s23, %s863_s1  ;;  %p514_p4 = scmp.lt.u32.totalorder %s512_s30, %s507_s10 }
  0x35   : > { %p510_p12 = pnand %p508_p11, %p479_p3  ;;  %p516_p8 = scmp.lt.u32.totalorder %s507_s10, %s758_s23 }
  0x36   : > { %p515_p5 = por %p514_p4, %p513_p2 }
  0x37   : > { %p511_p10 = pneg %p510_p12 }
  0x38   : > { %p517_p9 = por %p516_p8, %p515_p5 }
  0x3a   : > { %p518_p0 = pnand %p517_p9, %p511_p10 }
  0x3c   : > { %521 = shalt.err (!%p518_p0)
}
  0x3d   : > { %s522_s29 = scalar_lea.vmem %s197_s6, 128  ;;  %s610_s5 = smov [#allocation5]  }
  0x3e   : > { %p523_p1 = scmp.ne.s32.totalorder %s197_s6, %s522_s29  ;;  %s527_s20 = sshll.u32 %s610_s5, 4  ;;  %s528_s20 = int_to_ptr.vmem [resolvable:$false] %s527_s20 }
  0x3f   : > { %s529_s22 = scalar_lea.vmem %s528_s20, 256  ;;  %p530_p6 = scmp.lt.s32.totalorder %s197_s6, %s528_s20 }
  0x40   : > { %p525_p11 = pnand %p523_p1, %p479_p3  ;;  %p531_p7 = scmp.lt.s32.totalorder %s529_s22, %s522_s29 }
  0x42   : > { %p526_p12 = pneg %p525_p11  ;;  %p532_p2 = por %p531_p7, %p530_p6 }
  0x44   : > { %p533_p4 = pnand %p532_p2, %p526_p12 }
  0x46   : > { %536 = shalt.err (!%p533_p4)
}
  0x47   : > { %434 = dma.hbm_to_vmem [thread:$0]  (!%p711_p13), %s758_s23, 128, %s197_s6, %s186_s8  }
  0x48   : > { %p877_p10 = scmp.ne.s32.totalorder %s876_s13, 0 }
  0x49   : > { %s785_s25 = sand.u32 (!%p877_p10), 1, %s599_s16   ;;  %p878_p6 = scmp.ne.s32.totalorder (!%p877_p10), %s870_s26, 0 }
  0x4a   : > { %205 = sbr.rel (%p877_p10) target bundleno = 418 (0x1a2), region = 36  ;;  %s788_s10 = sshll.u32 (!%p877_p10), %s785_s25, 3 }
  0x4b   : > { %s208_s12 = scalar_lea.sflag (!%p877_p10), [#allocation3], %s785_s25  ;;  %s211_s7 = scalar_lea.vmem (!%p877_p10), [#allocation2], %s788_s10 }
  0x51   : > { %582 = dma.done.wait (%p878_p6), %s208_s12, 128  }
  0x52   : > { %584 = vsyncadd (%p878_p6), %s208_s12, 4294967168  ;;  %s217_s11 = scalar_lea.sflag [#allocation6], %s785_s25  ;;  %s220_s13 = scalar_lea.vmem [#allocation5], %s788_s10 }
  0x53   : > { %586 = dma.done.wait (%p878_p6), %s217_s11, 128  }
  0x54   : > { %588 = vsyncadd (%p878_p6), %s217_s11, 4294967168  ;;  %vm252_vm0 = vcmask 261120   ;;  %v250_v0 = vld [vmem:[%s211_s7] sm:$0xff]  ;;  %v251_v1 = vld [vmem:[%s220_s13] sm:$0xff]  ;;  %s419_s30 = sshll.u32 %s658_s19, 7  ;;  %s249_s9 = scalar_lea.vmem [#allocation7], %s788_s10 }
  0x55   : > { %v253_v2 = vsel %vm252_vm0, %v250_v0, 0.0  ;;  %v267_v3 = vsel %vm252_vm0, %v251_v1, 0.0  ;;  %v416_v24 = vld [vmem:[%s864_s2] ss:$0 sm:$0xff]  ;;  %s312_s14 = sshll.u32 %s249_s9, 4  ;;  %s817_s20 = scalar_lea.hbm %s866_s4, %s419_s30  ;;  %s819_s14 = int_to_ptr.vmem [resolvable:$true] %s312_s14 }
  0x56   : > { %254 = vadd.xlane.f32.xlu0 %v253_v2  ;;  %v417_v26 = vld [vmem:[%s865_s3] ss:$0 sm:$0xff]  ;;  %s299_s22 = scalar_lea.sflag [#allocation4], %s785_s25  ;;  %s537_s12 = scalar_lea.vmem %s819_s14, 128 }
  0x57   : > { %p538_p13 = scmp.ne.s32.totalorder %s819_s14, %s537_s12  ;;  %p879_p3 = scmp.ne.s32.totalorder %s871_s27, 0 }
  0x58   : > { %s611_s19 = smov [#allocation7]  }
  0x59   : > { %p539_p7 = pnand %p538_p13, %p879_p3  ;;  %s541_s10 = sshll.u32 %s611_s19, 4  ;;  %s542_s10 = int_to_ptr.vmem [resolvable:$false] %s541_s10 }
  0x5a   : > { %268 = vadd.xlane.f32.xlu0 %v267_v3  ;;  %s543_s7 = scalar_lea.vmem %s542_s10, 256  ;;  %p544_p8 = scmp.lt.s32.totalorder %s819_s14, %s542_s10 }
  0x5b   : > { %p540_p5 = pneg %p539_p7  ;;  %p545_p9 = scmp.lt.s32.totalorder %s543_s7, %s537_s12 }
  0x5d   : > { %p546_p0 = por %p545_p9, %p544_p8 }
  0x5f   : > { %p547_p1 = pnand %p546_p0, %p540_p5 }
  0xe3   : > { %v255_v4 = vpop.xlane.xlu0 %254 }
  0xe4   : > { %v257_v5 = vmul.f32 0.03125, %v255_v4 }
  0xe6   : > { %v258_v6 = vsub.f32 %v250_v0, %v257_v5 }
  0xe7   : > { %v269_v7 = vpop.xlane.xlu0 %268 }
  0xe8   : > { %v270_v8 = vmul.f32 0.03125, %v269_v7  ;;  %v259_v9 = vmul.f32 %v258_v6, %v258_v6 }
  0xea   : > { %v271_v10 = vsub.f32 %v251_v1, %v270_v8  ;;  %v260_v11 = vsel %vm252_vm0, %v259_v9, 0.0 }
  0xeb   : > { %261 = vadd.xlane.f32.xlu1 %v260_v11 }
  0xec   : > { %v272_v12 = vmul.f32 %v271_v10, %v271_v10 }
  0xee   : > { %v273_v13 = vsel %vm252_vm0, %v272_v12, 0.0 }
  0xef   : > { %274 = vadd.xlane.f32.xlu1 %v273_v13 }
 0x178   : > { %v262_v14 = vpop.xlane.xlu1 %261 }
 0x179   : > { %v263_v15 = vmul.f32 0.03125, %v262_v14 }
 0x17b   : > { %v264_v16 = vadd.f32 1e-05, %v263_v15 }
 0x17c   : > { %v275_v17 = vpop.xlane.xlu1 %274 }
 0x17d   : > { %v276_v18 = vmul.f32 0.03125, %v275_v17  ;;  %473 = vrsqrt.f32 %v264_v16 }
 0x17f   : > { %v277_v19 = vadd.f32 1e-05, %v276_v18 }
 0x181   : > { %475 = vrsqrt.f32 %v277_v19 }
 0x187   : > { %v474_v20 = vpop.eup %473 }
 0x188   : > { %v266_v22 = vmul.f32 %v474_v20, %v258_v6 }
 0x18b   : > { %v476_v21 = vpop.eup %475 }
 0x18c   : > { %v279_v23 = vmul.f32 %v476_v21, %v271_v10 }
 0x18e   : > { %v280_v25 = vadd.f32 %v279_v23, %v266_v22 }
 0x190   : > { %v288_v27 = vmul.f32 %v416_v24, %v280_v25 }
 0x192   : > { %v296_v28 = vadd.f32 %v417_v26, %v288_v27 }
 0x194   : > { %297 = vst.msk [vmem:[%s249_s9] sm:$0xff] %vm252_vm0, %v296_v28 }
 0x195   : > { %550 = shalt.err (!%p547_p1)
}
 0x196   : > { %s551_s25 = scalar_lea.hbm %s817_s20, 128  ;;  %s555_s26 = scalar_lea.hbm %s866_s4, 256 }
 0x197   : > { %p552_p11 = scmp.ne.s32.totalorder %s817_s20, %s551_s25  ;;  %p556_p4 = scmp.lt.u32.totalorder %s817_s20, %s866_s4 }
 0x198   : > { %p557_p10 = scmp.lt.u32.totalorder %s555_s26, %s551_s25  ;;  %p559_p13 = scmp.lt.u32.totalorder %s551_s25, %s817_s20 }
 0x199   : > { %p553_p12 = pnand %p552_p11, %p879_p3 }
 0x19a   : > { %p558_p6 = por %p557_p10, %p556_p4 }
 0x19b   : > { %p554_p2 = pneg %p553_p12 }
 0x19c   : > { %p560_p7 = por %p559_p13, %p558_p6 }
 0x19e   : > { %p561_p5 = pnand %p560_p7, %p554_p2 }
 0x1a0   : > { %564 = shalt.err (!%p561_p5)
}
 0x1a1   : > { %426 = dma.vmem_to_hbm [thread:$0]  (%p879_p3), %s819_s14, 128, %s817_s20, %s299_s22  }
 0x1a2 PF: > { %s324_s8 = sand.u32 1, %s595_s15   ;;  %p880_p8 = scmp.ne.s32.totalorder %s872_s28, 0 }
 0x1a3   : > { %p881_p9 = scmp.ge.s32.totalorder %s607_s18, 2  ;;  %s325_s30 = scalar_lea.sflag [#allocation4], %s324_s8 }
 0x1a5   : > { %p436_p0 = pnand %p881_p9, %p880_p8 }
 0x1a7   : > { %590 = dma.done.wait (!%p436_p0), %s325_s30, 128  }
 0x1a8   : > { %592 = vsyncadd (!%p436_p0), %s325_s30, 4294967168  ;;  %p20_p1 = scmp.ge.s32.totalorder %s662_s21, 4   ;;  %s882_s15 = smov %s599_s16 }
 0x1a9   : > { %s883_s16 = smov %s603_s17  ;;  %s884_s17 = smov %s674_s24 }
 0x1aa   : > { %s885_s18 = smov %s662_s21  ;;  %22 = sbr.rel (!%p20_p1) target bundleno = 7 (0x7), region = 94 }
 0x1b1   :  { %330 = vsyncpa [#allocation3], 1 }
 0x1b2   :  { %332 = vsyncpa [#allocation3 + $0x1], 1 }
 0x1b3   :  { %333 = vsyncpa [#allocation6], 1 }
 0x1b4   :  { %335 = vsyncpa [#allocation6 + $0x1], 1 }
 0x1b5   :  { %336 = vsyncpa [#allocation4], 1 }
 0x1b6   :  { %338 = vsyncpa [#allocation4 + $0x1], 1 }

</bundles_post_ra>
